<compile_context>
chip_gen: v5e
topology: v5e:2x2
jax: 0.10.0
libtpu: 0.0.40
codegen_flags: <defaults>
</compile_context>

<pallas_src>
import functools

import jax
import jax.numpy as jnp
from jax.experimental import pallas as pl
from jax.experimental.pallas import tpu as pltpu


# ---------------------------------------------------------------------------
# Constant interpolation / pooling matrices (plain JAX, outside the kernel).
# ---------------------------------------------------------------------------
def _bilinear_matrix(out_size, in_size):
    """Rows of F.interpolate(mode='bilinear', align_corners=False)."""
    scale = in_size / out_size
    dst = jnp.arange(out_size, dtype=jnp.float32)
    src = jnp.maximum((dst + 0.5) * scale - 0.5, 0.0)
    i0 = jnp.clip(jnp.floor(src).astype(jnp.int32), 0, in_size - 1)
    i1 = jnp.minimum(i0 + 1, in_size - 1)
    w1 = src - i0.astype(jnp.float32)
    w0 = 1.0 - w1
    m = (w0[:, None] * jax.nn.one_hot(i0, in_size, dtype=jnp.float32)
         + w1[:, None] * jax.nn.one_hot(i1, in_size, dtype=jnp.float32))
    return m  # (out_size, in_size)


def _adaptive_pool_matrix(out_size, in_size):
    """Rows of F.adaptive_avg_pool1d (bin averages, PyTorch bin rule)."""
    i = jnp.arange(out_size)
    starts = jnp.floor(i * in_size / out_size).astype(jnp.int32)
    ends = jnp.ceil((i + 1) * in_size / out_size).astype(jnp.int32)
    cols = jnp.arange(in_size)
    mask = (cols[None, :] >= starts[:, None]) & (cols[None, :] < ends[:, None])
    counts = (ends - starts).astype(jnp.float32)
    return mask.astype(jnp.float32) / counts[:, None]  # (out_size, in_size)


# ---------------------------------------------------------------------------
# Kernel: whole SPP forward for one batch element.
# ---------------------------------------------------------------------------
def _spp_kernel(*refs, num_levels, bt, level_size, gsizes):
    (x_ref, s0_ref, b0_ref, w0_ref, mpool_ref, slvl_ref, blvl_ref) = refs[:7]
    level_refs = refs[7:7 + 2 * num_levels]
    sf_ref, bf_ref, wf_ref, o_ref, zf_ref = refs[7 + 2 * num_levels:]

    f32 = jnp.float32
    bf16 = jnp.bfloat16

    # spp_bn: BN(eval) -> ReLU (VPU, f32) -> 1x1 conv (MXU, bf16 operands).
    x = x_ref[0].astype(f32)                                       # (Cin, HW)
    z0 = jnp.maximum(x * s0_ref[...] + b0_ref[...], 0.0)
    y = jnp.dot(w0_ref[...], z0.astype(bf16),
                preferred_element_type=f32)                        # (bt, HW)

    # Bottleneck rows of the fuse input (spp_fuse BN + ReLU), into VMEM scratch.
    zf_ref[0:bt, :] = jnp.maximum(
        y * sf_ref[0:bt, :] + bf_ref[0:bt, :], 0.0).astype(zf_ref.dtype)

    # All pyramid levels' adaptive_avg_pool2d in a single dot (K = HW is the
    # only large contraction; columns are grouped level-by-level).
    pooled = jnp.dot(y.astype(bf16), mpool_ref[...],
                     preferred_element_type=f32)                   # (bt, Gtot)
    z_all = jnp.maximum(pooled * slvl_ref[...] + blvl_ref[...], 0.0).astype(bf16)

    # Per-level 1x1 conv + bilinear upsample; fuse BN/ReLU rows into scratch.
    off = 0
    for l in range(num_levels):
        g = gsizes[l]
        wl_ref, mup_ref = level_refs[2 * l], level_refs[2 * l + 1]
        zl = z_all[:, off:off + g]                                 # (bt, g)
        cl = jnp.dot(wl_ref[...], zl, preferred_element_type=f32)  # (lvl, g)
        ul = jnp.dot(cl.astype(bf16), mup_ref[...],
                     preferred_element_type=f32)                   # (lvl, HW)
        r0 = bt + l * level_size
        zf_ref[r0:r0 + level_size, :] = jnp.maximum(
            ul * sf_ref[r0:r0 + level_size, :]
            + bf_ref[r0:r0 + level_size, :], 0.0).astype(zf_ref.dtype)
        off += g

    # spp_fuse conv over the whole (VMEM-only) concat: ONE dot, K=final_size.
    out = jnp.dot(wf_ref[...], zf_ref[...].astype(bf16),
                  preferred_element_type=f32)                      # (out, HW)
    o_ref[0] = out.astype(o_ref.dtype)


# ---------------------------------------------------------------------------
# Wrapper
# ---------------------------------------------------------------------------
def spatial_pyramid_pooling(x, params, grids, num_levels, eps=1e-5):
    N, Cin, H, W = x.shape
    HW = H * W
    bt = params['w0'].shape[0]
    level_size = params['level_ws'][0].shape[0]
    out_size = params['w_fuse'].shape[0]
    final_size = params['w_fuse'].shape[1]
    ar = W / H

    f32, bf16 = jnp.float32, jnp.bfloat16

    def fold_bn(bn):
        gamma, beta, mean, var = bn
        s = gamma / jnp.sqrt(var + eps)
        sh = beta - mean * s
        return s.reshape(-1, 1).astype(f32), sh.reshape(-1, 1).astype(f32)

    # spp_bn + fuse params.
    s0, b0 = fold_bn(params['bn0'])
    w0 = params['w0'][:, :, 0, 0].astype(bf16)                     # (bt, Cin)
    sf_full, bf_full = fold_bn(params['bn_fuse'])                  # (final, 1)
    wf = params['w_fuse'][:, :, 0, 0].astype(bf16)                 # (out, final)

    # Per-level constants, packed: one pool matrix / one BN-scale / one BN-shift
    # spanning all levels' columns; per-level conv weight + upsample matrix.
    mpool_cols, slvl_cols, blvl_cols, level_inputs, gsizes = [], [], [], [], []
    for l in range(num_levels):
        g = grids[l]
        gh, gw = g, max(1, round(ar * g))
        gsizes.append(gh * gw)
        mpool_cols.append(jnp.kron(_adaptive_pool_matrix(gh, H),
                                   _adaptive_pool_matrix(gw, W)).T)  # (HW, g2)
        sl, bl = fold_bn(params['level_bns'][l])
        slvl_cols.append(jnp.broadcast_to(sl, (bt, gh * gw)))
        blvl_cols.append(jnp.broadcast_to(bl, (bt, gh * gw)))
        wl = params['level_ws'][l][:, :, 0, 0].astype(bf16)          # (lvl, bt)
        mupT = jnp.kron(_bilinear_matrix(H, gh),
                        _bilinear_matrix(W, gw)).T.astype(bf16)      # (g2, HW)
        level_inputs += [wl, mupT]

    mpool_allT = jnp.concatenate(mpool_cols, axis=1).astype(bf16)    # (HW, Gtot)
    slvl = jnp.concatenate(slvl_cols, axis=1).astype(f32)            # (bt, Gtot)
    blvl = jnp.concatenate(blvl_cols, axis=1).astype(f32)

    inputs = ([x.reshape(N, Cin, HW), s0, b0, w0, mpool_allT, slvl, blvl]
              + level_inputs + [sf_full, bf_full, wf])

    in_specs = [pl.BlockSpec((1, Cin, HW), lambda n: (n, 0, 0))]
    in_specs += [pl.BlockSpec(a.shape, lambda n: (0, 0)) for a in inputs[1:]]

    kernel = functools.partial(_spp_kernel, num_levels=num_levels, bt=bt,
                               level_size=level_size, gsizes=tuple(gsizes))

    out_flat = pl.pallas_call(
        kernel,
        out_shape=jax.ShapeDtypeStruct((N, out_size, HW), x.dtype),
        grid_spec=pltpu.PrefetchScalarGridSpec(
            num_scalar_prefetch=0,
            grid=(N,),
            in_specs=in_specs,
            out_specs=pl.BlockSpec((1, out_size, HW), lambda n: (n, 0, 0)),
            scratch_shapes=[pltpu.VMEM((final_size, HW), jnp.float32)]),
        compiler_params=pltpu.CompilerParams(
            dimension_semantics=("parallel",)),
    )(*inputs)

    return out_flat.reshape(N, out_size, H, W)


# ---------------------------------------------------------------------------
# Pure-JAX f32 reference of the same forward pass (independent pooling impl).
# ---------------------------------------------------------------------------
def reference(x, params, grids, num_levels, eps=1e-5):
    N, Cin, H, W = x.shape
    ar = W / H

    def bn_relu_conv(t, bn, w):
        gamma, beta, mean, var = bn
        s = gamma / jnp.sqrt(var + eps)
        sh = beta - mean * s
        t = t * s[None, :, None, None] + sh[None, :, None, None]
        t = jnp.maximum(t, 0.0)
        return jnp.einsum('oi,nihw->nohw', w[:, :, 0, 0], t)

    def adaptive_avg_pool(t, gh, gw):
        _, _, Hh, Ww = t.shape
        rows = []
        for i in range(gh):
            hs, he = (i * Hh) // gh, ((i + 1) * Hh + gh - 1) // gh
            cols = []
            for j in range(gw):
                ws, we = (j * Ww) // gw, ((j + 1) * Ww + gw - 1) // gw
                cols.append(jnp.mean(t[:, :, hs:he, ws:we], axis=(2, 3)))
            rows.append(jnp.stack(cols, axis=-1))
        return jnp.stack(rows, axis=-2)

    y = bn_relu_conv(x.astype(jnp.float32), params['bn0'], params['w0'])
    levels = [y]
    for l in range(num_levels):
        g = grids[l]
        gh, gw = g, max(1, round(ar * g))
        pooled = adaptive_avg_pool(y, gh, gw)
        lvl = bn_relu_conv(pooled, params['level_bns'][l], params['level_ws'][l])
        uh = _bilinear_matrix(H, gh)
        uw = _bilinear_matrix(W, gw)
        lvl = jnp.einsum('hi,ncij,wj->nchw', uh, lvl, uw)
        levels.append(lvl)
    cat = jnp.concatenate(levels, axis=1)
    return bn_relu_conv(cat, params['bn_fuse'], params['w_fuse'])


# ---------------------------------------------------------------------------
if __name__ == "__main__":
    key = jax.random.PRNGKey(0)
    keys = iter(jax.random.split(key, 64))

    # Small, module-consistent shapes.
    N, Cin, H, W = 2, 4, 16, 16
    bt_size, level_size, out_size = 8, 4, 8
    num_levels = 3
    grids = (6, 3, 2, 1)          # module default; only grids[:num_levels] used
    final_size = bt_size + num_levels * level_size

    def bn_params(c):
        return (1.0 + 0.1 * jax.random.normal(next(keys), (c,), jnp.float32),
                0.1 * jax.random.normal(next(keys), (c,), jnp.float32),
                0.1 * jax.random.normal(next(keys), (c,), jnp.float32),
                jax.random.uniform(next(keys), (c,), jnp.float32,
                                   minval=0.5, maxval=1.5))

    def conv_w(co, ci):
        return 0.3 * jax.random.normal(next(keys), (co, ci, 1, 1), jnp.float32)

    x = jax.random.normal(next(keys), (N, Cin, H, W), jnp.float32)

    params = dict(
        bn0=bn_params(Cin), w0=conv_w(bt_size, Cin),
        level_bns=[bn_params(bt_size) for _ in range(num_levels)],
        level_ws=[conv_w(level_size, bt_size) for _ in range(num_levels)],
        bn_fuse=bn_params(final_size), w_fuse=conv_w(out_size, final_size),
    )

    out = spatial_pyramid_pooling(x, params, grids, num_levels)
    out = jax.block_until_ready(out)

    ref = reference(x, params, grids, num_levels)
    err = float(jnp.max(jnp.abs(out.astype(jnp.float32) - ref)))
    scale = float(jnp.max(jnp.abs(ref)))
    assert out.shape == (N, out_size, H, W)
    # Tolerance covers bf16 MXU operands (f32 accumulation) vs the f32 XLA ref.
    tol = 5e-2 * max(scale, 1.0)
    if err > tol:
        raise AssertionError(
            f"kernel/reference mismatch, max abs err = {err} (tol {tol})")
    print("KERNEL_OK")
</pallas_src>

<mosaic_0001>
module attributes {stable_mosaic.version = 11 : i64} {
  func.func @_spp_kernel(%arg0: i32, %arg1: memref<1x4x256xf32, #tpu.memory_space<vmem>>, %arg2: memref<4x1xf32, #tpu.memory_space<vmem>>, %arg3: memref<4x1xf32, #tpu.memory_space<vmem>>, %arg4: memref<8x4xbf16, #tpu.memory_space<vmem>>, %arg5: memref<256x49xbf16, #tpu.memory_space<vmem>>, %arg6: memref<8x49xf32, #tpu.memory_space<vmem>>, %arg7: memref<8x49xf32, #tpu.memory_space<vmem>>, %arg8: memref<4x8xbf16, #tpu.memory_space<vmem>>, %arg9: memref<36x256xbf16, #tpu.memory_space<vmem>>, %arg10: memref<4x8xbf16, #tpu.memory_space<vmem>>, %arg11: memref<9x256xbf16, #tpu.memory_space<vmem>>, %arg12: memref<4x8xbf16, #tpu.memory_space<vmem>>, %arg13: memref<4x256xbf16, #tpu.memory_space<vmem>>, %arg14: memref<20x1xf32, #tpu.memory_space<vmem>>, %arg15: memref<20x1xf32, #tpu.memory_space<vmem>>, %arg16: memref<8x20xbf16, #tpu.memory_space<vmem>>, %arg17: memref<1x8x256xf32, #tpu.memory_space<vmem>>, %arg18: memref<20x256xf32, #tpu.memory_space<vmem>>) attributes {dimension_semantics = [#tpu.dimension_semantics<parallel>], iteration_bounds = array<i64: 2>, scalar_prefetch = 0 : i64, scratch_operands = 1 : i64, tpu.core_type = #tpu.core_type<tc>, window_params = [{transform_indices = @transform_0, window_bounds = array<i64: 1, 4, 256>}, {pipeline_mode = #tpu.pipeline_mode<synchronous>, transform_indices = @transform_1, window_bounds = array<i64: 4, 1>}, {pipeline_mode = #tpu.pipeline_mode<synchronous>, transform_indices = @transform_2, window_bounds = array<i64: 4, 1>}, {pipeline_mode = #tpu.pipeline_mode<synchronous>, transform_indices = @transform_3, window_bounds = array<i64: 8, 4>}, {pipeline_mode = #tpu.pipeline_mode<synchronous>, transform_indices = @transform_4, window_bounds = array<i64: 256, 49>}, {pipeline_mode = #tpu.pipeline_mode<synchronous>, transform_indices = @transform_5, window_bounds = array<i64: 8, 49>}, {pipeline_mode = #tpu.pipeline_mode<synchronous>, transform_indices = @transform_6, window_bounds = array<i64: 8, 49>}, {pipeline_mode = #tpu.pipeline_mode<synchronous>, transform_indices = @transform_7, window_bounds = array<i64: 4, 8>}, {pipeline_mode = #tpu.pipeline_mode<synchronous>, transform_indices = @transform_8, window_bounds = array<i64: 36, 256>}, {pipeline_mode = #tpu.pipeline_mode<synchronous>, transform_indices = @transform_9, window_bounds = array<i64: 4, 8>}, {pipeline_mode = #tpu.pipeline_mode<synchronous>, transform_indices = @transform_10, window_bounds = array<i64: 9, 256>}, {pipeline_mode = #tpu.pipeline_mode<synchronous>, transform_indices = @transform_11, window_bounds = array<i64: 4, 8>}, {pipeline_mode = #tpu.pipeline_mode<synchronous>, transform_indices = @transform_12, window_bounds = array<i64: 4, 256>}, {pipeline_mode = #tpu.pipeline_mode<synchronous>, transform_indices = @transform_13, window_bounds = array<i64: 20, 1>}, {pipeline_mode = #tpu.pipeline_mode<synchronous>, transform_indices = @transform_14, window_bounds = array<i64: 20, 1>}, {pipeline_mode = #tpu.pipeline_mode<synchronous>, transform_indices = @transform_15, window_bounds = array<i64: 8, 20>}, {transform_indices = @transform_16, window_bounds = array<i64: 1, 8, 256>}]} {
    %c0 = arith.constant 0 : index
    %c0_0 = arith.constant 0 : index
    %c0_1 = arith.constant 0 : index
    %0 = vector.load %arg1[%c0, %c0_0, %c0_1] : memref<1x4x256xf32, #tpu.memory_space<vmem>>, vector<1x4x256xf32>
    %1 = vector.shape_cast %0 : vector<1x4x256xf32> to vector<4x256xf32>
    %c0_2 = arith.constant 0 : index
    %c0_3 = arith.constant 0 : index
    %2 = vector.load %arg2[%c0_2, %c0_3] : memref<4x1xf32, #tpu.memory_space<vmem>>, vector<4x1xf32>
    %3 = vector.broadcast %2 : vector<4x1xf32> to vector<4x256xf32>
    %4 = arith.mulf %1, %3 : vector<4x256xf32>
    %c0_4 = arith.constant 0 : index
    %c0_5 = arith.constant 0 : index
    %5 = vector.load %arg3[%c0_4, %c0_5] : memref<4x1xf32, #tpu.memory_space<vmem>>, vector<4x1xf32>
    %6 = vector.broadcast %5 : vector<4x1xf32> to vector<4x256xf32>
    %7 = arith.addf %4, %6 : vector<4x256xf32>
    %cst = arith.constant 0.000000e+00 : f32
    %8 = vector.broadcast %cst : f32 to vector<4x256xf32>
    %9 = arith.maximumf %7, %8 : vector<4x256xf32>
    %c0_6 = arith.constant 0 : index
    %c0_7 = arith.constant 0 : index
    %10 = vector.load %arg4[%c0_6, %c0_7] : memref<8x4xbf16, #tpu.memory_space<vmem>>, vector<8x4xbf16>
    %11 = arith.truncf %9 : vector<4x256xf32> to vector<4x256xbf16>
    %cst_8 = arith.constant dense<0.000000e+00> : vector<8x256xf32>
    %12 = tpu.matmul %10, %11, %cst_8 {dimension_numbers = #tpu.dot_dimension_numbers<[1], [0], [0], [1], [0, 0, 1, 1], [], []>} : vector<8x4xbf16>, vector<4x256xbf16>, vector<8x256xf32> -> vector<8x256xf32>
    %c0_9 = arith.constant 0 : index
    %c0_10 = arith.constant 0 : index
    %13 = vector.load %arg14[%c0_9, %c0_10] : memref<20x1xf32, #tpu.memory_space<vmem>>, vector<8x1xf32>
    %14 = vector.broadcast %13 : vector<8x1xf32> to vector<8x256xf32>
    %15 = arith.mulf %12, %14 : vector<8x256xf32>
    %c0_11 = arith.constant 0 : index
    %c0_12 = arith.constant 0 : index
    %16 = vector.load %arg15[%c0_11, %c0_12] : memref<20x1xf32, #tpu.memory_space<vmem>>, vector<8x1xf32>
    %17 = vector.broadcast %16 : vector<8x1xf32> to vector<8x256xf32>
    %18 = arith.addf %15, %17 : vector<8x256xf32>
    %cst_13 = arith.constant 0.000000e+00 : f32
    %19 = vector.broadcast %cst_13 : f32 to vector<8x256xf32>
    %20 = arith.maximumf %18, %19 : vector<8x256xf32>
    %c0_14 = arith.constant 0 : index
    %c0_15 = arith.constant 0 : index
    %21 = vector.load %arg18[%c0_14, %c0_15] : memref<20x256xf32, #tpu.memory_space<vmem>>, vector<8x256xf32>
    tpu.vector_store %arg18[%c0_14, %c0_15], %20 {strides = array<i32>} : memref<20x256xf32, #tpu.memory_space<vmem>>, vector<8x256xf32>,
    %22 = arith.truncf %12 : vector<8x256xf32> to vector<8x256xbf16>
    %c0_16 = arith.constant 0 : index
    %c0_17 = arith.constant 0 : index
    %23 = vector.load %arg5[%c0_16, %c0_17] : memref<256x49xbf16, #tpu.memory_space<vmem>>, vector<256x49xbf16>
    %cst_18 = arith.constant dense<0.000000e+00> : vector<8x49xf32>
    %24 = tpu.matmul %22, %23, %cst_18 {dimension_numbers = #tpu.dot_dimension_numbers<[1], [0], [0], [1], [0, 0, 1, 1], [], []>} : vector<8x256xbf16>, vector<256x49xbf16>, vector<8x49xf32> -> vector<8x49xf32>
    %c0_19 = arith.constant 0 : index
    %c0_20 = arith.constant 0 : index
    %25 = vector.load %arg6[%c0_19, %c0_20] : memref<8x49xf32, #tpu.memory_space<vmem>>, vector<8x49xf32>
    %26 = arith.mulf %24, %25 : vector<8x49xf32>
    %c0_21 = arith.constant 0 : index
    %c0_22 = arith.constant 0 : index
    %27 = vector.load %arg7[%c0_21, %c0_22] : memref<8x49xf32, #tpu.memory_space<vmem>>, vector<8x49xf32>
    %28 = arith.addf %26, %27 : vector<8x49xf32>
    %cst_23 = arith.constant 0.000000e+00 : f32
    %29 = vector.broadcast %cst_23 : f32 to vector<8x49xf32>
    %30 = arith.maximumf %28, %29 : vector<8x49xf32>
    %31 = arith.truncf %30 : vector<8x49xf32> to vector<8x49xbf16>
    %32 = vector.extract_strided_slice %31 {offsets = [0, 0], sizes = [8, 36], strides = [1, 1]} : vector<8x49xbf16> to vector<8x36xbf16>
    %c0_24 = arith.constant 0 : index
    %c0_25 = arith.constant 0 : index
    %33 = vector.load %arg8[%c0_24, %c0_25] : memref<4x8xbf16, #tpu.memory_space<vmem>>, vector<4x8xbf16>
    %cst_26 = arith.constant dense<0.000000e+00> : vector<4x36xf32>
    %34 = tpu.matmul %33, %32, %cst_26 {dimension_numbers = #tpu.dot_dimension_numbers<[1], [0], [0], [1], [0, 0, 1, 1], [], []>} : vector<4x8xbf16>, vector<8x36xbf16>, vector<4x36xf32> -> vector<4x36xf32>
    %35 = arith.truncf %34 : vector<4x36xf32> to vector<4x36xbf16>
    %c0_27 = arith.constant 0 : index
    %c0_28 = arith.constant 0 : index
    %36 = vector.load %arg9[%c0_27, %c0_28] : memref<36x256xbf16, #tpu.memory_space<vmem>>, vector<36x256xbf16>
    %cst_29 = arith.constant dense<0.000000e+00> : vector<4x256xf32>
    %37 = tpu.matmul %35, %36, %cst_29 {dimension_numbers = #tpu.dot_dimension_numbers<[1], [0], [0], [1], [0, 0, 1, 1], [], []>} : vector<4x36xbf16>, vector<36x256xbf16>, vector<4x256xf32> -> vector<4x256xf32>
    %c8 = arith.constant 8 : index
    %c0_30 = arith.constant 0 : index
    %38 = vector.load %arg14[%c8, %c0_30] : memref<20x1xf32, #tpu.memory_space<vmem>>, vector<4x1xf32>
    %39 = vector.broadcast %38 : vector<4x1xf32> to vector<4x256xf32>
    %40 = arith.mulf %37, %39 : vector<4x256xf32>
    %c8_31 = arith.constant 8 : index
    %c0_32 = arith.constant 0 : index
    %41 = vector.load %arg15[%c8_31, %c0_32] : memref<20x1xf32, #tpu.memory_space<vmem>>, vector<4x1xf32>
    %42 = vector.broadcast %41 : vector<4x1xf32> to vector<4x256xf32>
    %43 = arith.addf %40, %42 : vector<4x256xf32>
    %cst_33 = arith.constant 0.000000e+00 : f32
    %44 = vector.broadcast %cst_33 : f32 to vector<4x256xf32>
    %45 = arith.maximumf %43, %44 : vector<4x256xf32>
    %c8_34 = arith.constant 8 : index
    %c0_35 = arith.constant 0 : index
    %46 = vector.load %arg18[%c8_34, %c0_35] : memref<20x256xf32, #tpu.memory_space<vmem>>, vector<4x256xf32>
    tpu.vector_store %arg18[%c8_34, %c0_35], %45 {strides = array<i32>} : memref<20x256xf32, #tpu.memory_space<vmem>>, vector<4x256xf32>,
    %47 = vector.extract_strided_slice %31 {offsets = [0, 36], sizes = [8, 9], strides = [1, 1]} : vector<8x49xbf16> to vector<8x9xbf16>
    %c0_36 = arith.constant 0 : index
    %c0_37 = arith.constant 0 : index
    %48 = vector.load %arg10[%c0_36, %c0_37] : memref<4x8xbf16, #tpu.memory_space<vmem>>, vector<4x8xbf16>
    %cst_38 = arith.constant dense<0.000000e+00> : vector<4x9xf32>
    %49 = tpu.matmul %48, %47, %cst_38 {dimension_numbers = #tpu.dot_dimension_numbers<[1], [0], [0], [1], [0, 0, 1, 1], [], []>} : vector<4x8xbf16>, vector<8x9xbf16>, vector<4x9xf32> -> vector<4x9xf32>
    %50 = arith.truncf %49 : vector<4x9xf32> to vector<4x9xbf16>
    %c0_39 = arith.constant 0 : index
    %c0_40 = arith.constant 0 : index
    %51 = vector.load %arg11[%c0_39, %c0_40] : memref<9x256xbf16, #tpu.memory_space<vmem>>, vector<9x256xbf16>
    %cst_41 = arith.constant dense<0.000000e+00> : vector<4x256xf32>
    %52 = tpu.matmul %50, %51, %cst_41 {dimension_numbers = #tpu.dot_dimension_numbers<[1], [0], [0], [1], [0, 0, 1, 1], [], []>} : vector<4x9xbf16>, vector<9x256xbf16>, vector<4x256xf32> -> vector<4x256xf32>
    %c12 = arith.constant 12 : index
    %c0_42 = arith.constant 0 : index
    %53 = vector.load %arg14[%c12, %c0_42] : memref<20x1xf32, #tpu.memory_space<vmem>>, vector<4x1xf32>
    %54 = vector.broadcast %53 : vector<4x1xf32> to vector<4x256xf32>
    %55 = arith.mulf %52, %54 : vector<4x256xf32>
    %c12_43 = arith.constant 12 : index
    %c0_44 = arith.constant 0 : index
    %56 = vector.load %arg15[%c12_43, %c0_44] : memref<20x1xf32, #tpu.memory_space<vmem>>, vector<4x1xf32>
    %57 = vector.broadcast %56 : vector<4x1xf32> to vector<4x256xf32>
    %58 = arith.addf %55, %57 : vector<4x256xf32>
    %cst_45 = arith.constant 0.000000e+00 : f32
    %59 = vector.broadcast %cst_45 : f32 to vector<4x256xf32>
    %60 = arith.maximumf %58, %59 : vector<4x256xf32>
    %c12_46 = arith.constant 12 : index
    %c0_47 = arith.constant 0 : index
    %61 = vector.load %arg18[%c12_46, %c0_47] : memref<20x256xf32, #tpu.memory_space<vmem>>, vector<4x256xf32>
    tpu.vector_store %arg18[%c12_46, %c0_47], %60 {strides = array<i32>} : memref<20x256xf32, #tpu.memory_space<vmem>>, vector<4x256xf32>,
    %62 = vector.extract_strided_slice %31 {offsets = [0, 45], sizes = [8, 4], strides = [1, 1]} : vector<8x49xbf16> to vector<8x4xbf16>
    %c0_48 = arith.constant 0 : index
    %c0_49 = arith.constant 0 : index
    %63 = vector.load %arg12[%c0_48, %c0_49] : memref<4x8xbf16, #tpu.memory_space<vmem>>, vector<4x8xbf16>
    %cst_50 = arith.constant dense<0.000000e+00> : vector<4x4xf32>
    %64 = tpu.matmul %63, %62, %cst_50 {dimension_numbers = #tpu.dot_dimension_numbers<[1], [0], [0], [1], [0, 0, 1, 1], [], []>} : vector<4x8xbf16>, vector<8x4xbf16>, vector<4x4xf32> -> vector<4x4xf32>
    %65 = arith.truncf %64 : vector<4x4xf32> to vector<4x4xbf16>
    %c0_51 = arith.constant 0 : index
    %c0_52 = arith.constant 0 : index
    %66 = vector.load %arg13[%c0_51, %c0_52] : memref<4x256xbf16, #tpu.memory_space<vmem>>, vector<4x256xbf16>
    %cst_53 = arith.constant dense<0.000000e+00> : vector<4x256xf32>
    %67 = tpu.matmul %65, %66, %cst_53 {dimension_numbers = #tpu.dot_dimension_numbers<[1], [0], [0], [1], [0, 0, 1, 1], [], []>} : vector<4x4xbf16>, vector<4x256xbf16>, vector<4x256xf32> -> vector<4x256xf32>
    %c16 = arith.constant 16 : index
    %c0_54 = arith.constant 0 : index
    %68 = vector.load %arg14[%c16, %c0_54] : memref<20x1xf32, #tpu.memory_space<vmem>>, vector<4x1xf32>
    %69 = vector.broadcast %68 : vector<4x1xf32> to vector<4x256xf32>
    %70 = arith.mulf %67, %69 : vector<4x256xf32>
    %c16_55 = arith.constant 16 : index
    %c0_56 = arith.constant 0 : index
    %71 = vector.load %arg15[%c16_55, %c0_56] : memref<20x1xf32, #tpu.memory_space<vmem>>, vector<4x1xf32>
    %72 = vector.broadcast %71 : vector<4x1xf32> to vector<4x256xf32>
    %73 = arith.addf %70, %72 : vector<4x256xf32>
    %cst_57 = arith.constant 0.000000e+00 : f32
    %74 = vector.broadcast %cst_57 : f32 to vector<4x256xf32>
    %75 = arith.maximumf %73, %74 : vector<4x256xf32>
    %c16_58 = arith.constant 16 : index
    %c0_59 = arith.constant 0 : index
    %76 = vector.load %arg18[%c16_58, %c0_59] : memref<20x256xf32, #tpu.memory_space<vmem>>, vector<4x256xf32>
    tpu.vector_store %arg18[%c16_58, %c0_59], %75 {strides = array<i32>} : memref<20x256xf32, #tpu.memory_space<vmem>>, vector<4x256xf32>,
    %c0_60 = arith.constant 0 : index
    %c0_61 = arith.constant 0 : index
    %77 = vector.load %arg16[%c0_60, %c0_61] : memref<8x20xbf16, #tpu.memory_space<vmem>>, vector<8x20xbf16>
    %c0_62 = arith.constant 0 : index
    %c0_63 = arith.constant 0 : index
    %78 = vector.load %arg18[%c0_62, %c0_63] : memref<20x256xf32, #tpu.memory_space<vmem>>, vector<20x256xf32>
    %79 = arith.truncf %78 : vector<20x256xf32> to vector<20x256xbf16>
    %cst_64 = arith.constant dense<0.000000e+00> : vector<8x256xf32>
    %80 = tpu.matmul %77, %79, %cst_64 {dimension_numbers = #tpu.dot_dimension_numbers<[1], [0], [0], [1], [0, 0, 1, 1], [], []>} : vector<8x20xbf16>, vector<20x256xbf16>, vector<8x256xf32> -> vector<8x256xf32>
    %c0_65 = arith.constant 0 : index
    %c0_66 = arith.constant 0 : index
    %c0_67 = arith.constant 0 : index
    %81 = vector.load %arg17[%c0_65, %c0_66, %c0_67] : memref<1x8x256xf32, #tpu.memory_space<vmem>>, vector<1x8x256xf32>
    %82 = vector.shape_cast %81 : vector<1x8x256xf32> to vector<8x256xf32>
    %83 = vector.shape_cast %80 : vector<8x256xf32> to vector<1x8x256xf32>
    tpu.vector_store %arg17[%c0_65, %c0_66, %c0_67], %83 {strides = array<i32>} : memref<1x8x256xf32, #tpu.memory_space<vmem>>, vector<1x8x256xf32>,
    return
  }
  func.func @transform_0(%arg0: i32) -> (i32, i32, i32) {
    %c0_i32 = arith.constant 0 : i32
    %c0_i32_0 = arith.constant 0 : i32
    %c0_i32_1 = arith.constant 0 : i32
    return %arg0, %c0_i32, %c0_i32_0 : i32, i32, i32
  }
  func.func @transform_1(%arg0: i32) -> (i32, i32) {
    %c0_i32 = arith.constant 0 : i32
    %c0_i32_0 = arith.constant 0 : i32
    %c0_i32_1 = arith.constant 0 : i32
    return %c0_i32, %c0_i32_0 : i32, i32
  }
  func.func @transform_2(%arg0: i32) -> (i32, i32) {
    %c0_i32 = arith.constant 0 : i32
    %c0_i32_0 = arith.constant 0 : i32
    %c0_i32_1 = arith.constant 0 : i32
    return %c0_i32, %c0_i32_0 : i32, i32
  }
  func.func @transform_3(%arg0: i32) -> (i32, i32) {
    %c0_i32 = arith.constant 0 : i32
    %c0_i32_0 = arith.constant 0 : i32
    %c0_i32_1 = arith.constant 0 : i32
    return %c0_i32, %c0_i32_0 : i32, i32
  }
  func.func @transform_4(%arg0: i32) -> (i32, i32) {
    %c0_i32 = arith.constant 0 : i32
    %c0_i32_0 = arith.constant 0 : i32
    %c0_i32_1 = arith.constant 0 : i32
    return %c0_i32, %c0_i32_0 : i32, i32
  }
  func.func @transform_5(%arg0: i32) -> (i32, i32) {
    %c0_i32 = arith.constant 0 : i32
    %c0_i32_0 = arith.constant 0 : i32
    %c0_i32_1 = arith.constant 0 : i32
    return %c0_i32, %c0_i32_0 : i32, i32
  }
  func.func @transform_6(%arg0: i32) -> (i32, i32) {
    %c0_i32 = arith.constant 0 : i32
    %c0_i32_0 = arith.constant 0 : i32
    %c0_i32_1 = arith.constant 0 : i32
    return %c0_i32, %c0_i32_0 : i32, i32
  }
  func.func @transform_7(%arg0: i32) -> (i32, i32) {
    %c0_i32 = arith.constant 0 : i32
    %c0_i32_0 = arith.constant 0 : i32
    %c0_i32_1 = arith.constant 0 : i32
    return %c0_i32, %c0_i32_0 : i32, i32
  }
  func.func @transform_8(%arg0: i32) -> (i32, i32) {
    %c0_i32 = arith.constant 0 : i32
    %c0_i32_0 = arith.constant 0 : i32
    %c0_i32_1 = arith.constant 0 : i32
    return %c0_i32, %c0_i32_0 : i32, i32
  }
  func.func @transform_9(%arg0: i32) -> (i32, i32) {
    %c0_i32 = arith.constant 0 : i32
    %c0_i32_0 = arith.constant 0 : i32
    %c0_i32_1 = arith.constant 0 : i32
    return %c0_i32, %c0_i32_0 : i32, i32
  }
  func.func @transform_10(%arg0: i32) -> (i32, i32) {
    %c0_i32 = arith.constant 0 : i32
    %c0_i32_0 = arith.constant 0 : i32
    %c0_i32_1 = arith.constant 0 : i32
    return %c0_i32, %c0_i32_0 : i32, i32
  }
  func.func @transform_11(%arg0: i32) -> (i32, i32) {
    %c0_i32 = arith.constant 0 : i32
    %c0_i32_0 = arith.constant 0 : i32
    %c0_i32_1 = arith.constant 0 : i32
    return %c0_i32, %c0_i32_0 : i32, i32
  }
  func.func @transform_12(%arg0: i32) -> (i32, i32) {
    %c0_i32 = arith.constant 0 : i32
    %c0_i32_0 = arith.constant 0 : i32
    %c0_i32_1 = arith.constant 0 : i32
    return %c0_i32, %c0_i32_0 : i32, i32
  }
  func.func @transform_13(%arg0: i32) -> (i32, i32) {
    %c0_i32 = arith.constant 0 : i32
    %c0_i32_0 = arith.constant 0 : i32
    %c0_i32_1 = arith.constant 0 : i32
    return %c0_i32, %c0_i32_0 : i32, i32
  }
  func.func @transform_14(%arg0: i32) -> (i32, i32) {
    %c0_i32 = arith.constant 0 : i32
    %c0_i32_0 = arith.constant 0 : i32
    %c0_i32_1 = arith.constant 0 : i32
    return %c0_i32, %c0_i32_0 : i32, i32
  }
  func.func @transform_15(%arg0: i32) -> (i32, i32) {
    %c0_i32 = arith.constant 0 : i32
    %c0_i32_0 = arith.constant 0 : i32
    %c0_i32_1 = arith.constant 0 : i32
    return %c0_i32, %c0_i32_0 : i32, i32
  }
  func.func @transform_16(%arg0: i32) -> (i32, i32, i32) {
    %c0_i32 = arith.constant 0 : i32
    %c0_i32_0 = arith.constant 0 : i32
    %c0_i32_1 = arith.constant 0 : i32
    return %arg0, %c0_i32, %c0_i32_0 : i32, i32, i32
  }
}

</mosaic_0001>

<bundles_post_ra>
// kernel: tpu_custom_call.1
= control target key start
LH: loop header
LB: loop body
LE: loop exit
PB: predicated region body
PF: predicated region fallthrough
CT: control target
= control target key end

     0   :  { %s1796_s0 = inlined_call_operand.vmem [shape: f32[2,4,256], index: 0, kind: input, shape index: {}]   ;;  %s1797_s1 = inlined_call_operand.vmem [shape: f32[4,1], index: 1, kind: input, shape index: {}]   ;;  %s1798_s2 = inlined_call_operand.vmem [shape: f32[4,1], index: 2, kind: input, shape index: {}]   ;;  %s1799_s3 = inlined_call_operand.vmem [shape: bf16[8,4], index: 3, kind: input, shape index: {}]   ;;  %s1800_s4 = inlined_call_operand.vmem [shape: bf16[256,49], index: 4, kind: input, shape index: {}]   ;;  %s1801_s5 = inlined_call_operand.vmem [shape: f32[8,49], index: 5, kind: input, shape index: {}]   ;;  %s1802_s6 = inlined_call_operand.vmem [shape: f32[8,49], index: 6, kind: input, shape index: {}]   ;;  %s1803_s7 = inlined_call_operand.vmem [shape: bf16[4,8], index: 7, kind: input, shape index: {}]   ;;  %s1804_s8 = inlined_call_operand.vmem [shape: bf16[36,256], index: 8, kind: input, shape index: {}]   ;;  %s1805_s9 = inlined_call_operand.vmem [shape: bf16[4,8], index: 9, kind: input, shape index: {}]   ;;  %s1806_s10 = inlined_call_operand.vmem [shape: bf16[9,256], index: 10, kind: input, shape index: {}]   ;;  %s1807_s11 = inlined_call_operand.vmem [shape: bf16[4,8], index: 11, kind: input, shape index: {}]   ;;  %s1808_s12 = inlined_call_operand.vmem [shape: bf16[4,256], index: 12, kind: input, shape index: {}]   ;;  %s1809_s13 = inlined_call_operand.vmem [shape: f32[20,1], index: 13, kind: input, shape index: {}]   ;;  %s1810_s14 = inlined_call_operand.vmem [shape: f32[20,1], index: 14, kind: input, shape index: {}]   ;;  %s1811_s15 = inlined_call_operand.vmem [shape: bf16[8,20], index: 15, kind: input, shape index: {}]   ;;  %s1812_s16 = inlined_call_operand.hbm [shape: f32[2,8,256], index: 16, kind: output, shape index: {}]  }
   0x1   :  { %1818 = sst [smem:[#allocation11_spill]] %s1796_s0 }
   0x2   :  { %1819 = sst [smem:[#allocation12_spill]] %s1797_s1 }
   0x3   :  { %1820 = sst [smem:[#allocation13_spill]] %s1798_s2 }
   0x4   :  { %21 = vsyncpa [#allocation4], 0 }
   0x5   :  { %23 = vsyncpa [#allocation4 + $0x1], 0  ;;  %s1527_s21 = smov 0   ;;  %s1529_s22 = smov 0  }
   0x6   :  { %s1531_s23 = smov 0   ;;  %s1533_s24 = smov 0  }
   0x7 LB: > { %1821 = sst [smem:[#allocation6_spill]] %s1423_s21  ;;  %s1548_s25 = sadd.s32 4294967295, %s1435_s24   ;;  %s1435_s24 = sphi %s1533_s24, %s1833_s24   ;;  %s1431_s23 = sphi %s1531_s23, %s1835_s23   ;;  %s1427_s22 = sphi %s1529_s22, %s1837_s22   ;;  %s1423_s21 = sphi %s1527_s21, %s1836_s21  }
   0x8   : > { %1822 = sst [smem:[#allocation7_spill]] %s1431_s23  ;;  %s1189_s26 = sadd.s32 4294967294, %s1435_s24  }
   0x9   : > { %s1552_s27 = sadd.s32 1, %s1435_s24   ;;  %s377_s28 = sadd.s32 1, %s1431_s23 }
   0xa   : > { %1823 = sst [smem:[#allocation8_spill]] %s1552_s27  ;;  %s374_s29 = ssub.s32 %s1435_s24, %s1552_s27 }
   0xb   : > { %p387_p0 = scmp.ne.s32.totalorder %s1431_s23, %s1427_s22  ;;  %p375_p1 = scmp.eq.s32.totalorder %s374_s29, 0 }
   0xc   : > { %p388_p2 = scmp.eq.s32.totalorder %s1548_s25, 1  ;;  %p393_p3 = scmp.ne.s32.totalorder %s1427_s22, %s1423_s21 }
   0xd   : > { %p394_p4 = scmp.eq.s32.totalorder %s1189_s26, 1  ;;  %p1192_p7 = scmp.ge.s32.totalorder %s1435_s24, 1 }
   0xe   : > { %s1563_s30 = scalar_select %p375_p1, %s1431_s23, %s377_s28  }
   0xf   : > { %p1565_p5 = por %p388_p2, %p387_p0  ;;  %p1569_p6 = por %p394_p4, %p393_p3 }
  0x10   : > { %1824 = sst [smem:[#allocation9_spill]] %s1563_s30  ;;  %p465_p8 = scmp.lt.s32.totalorder %s1435_s24, 3 }
  0x11   : > { %s1826_s17 = scalar_select %p1569_p6, 1, 0 }
  0x12   : > { %p466_p9 = pnand %p1192_p7, %p465_p8 }
  0x13   : > { %1827 = sst [smem:[#allocation10_spill]] %s1826_s17  ;;  %p515_p10 = scmp.lt.s32.totalorder (!%p466_p9), %s1548_s25, 1 }
  0x14   : > { %469 = sbr.rel (%p466_p9) target bundleno = 1022 (0x3fe), region = 84  ;;  %s1828_s1 = sld [smem:[#allocation12_spill]] (!%p466_p9) }
  0x15   : > { %s1829_s2 = sld [smem:[#allocation13_spill]] (!%p466_p9)  ;;  %s1440_s29 = smov (!%p466_p9), 92  }
  0x16   : > { %s1830_s23 = sld [smem:[#allocation11_spill]] (!%p466_p9)  ;;  %s1441_s27 = smov (!%p466_p9), 83  }
  0x17   : > { %s512_s26 = sand.u32 (!%p466_p9), 1, %s1427_s22  }
  0x18   : > { %s1193_s28 = sshll.u32 (!%p466_p9), %s512_s26, 4  ;;  %s1114_s18 = scalar_lea.sflag (!%p466_p9), [#allocation4], %s512_s26 }
  0x19   : > { %v1437_v1 = vmov 0   ;;  %v957_v3 = vld [vmem:[%s1809_s13 + $0xc] sm:$0xf]  ;;  %s516_s19 = scalar_select %p515_p10, %s1548_s25, 1  ;;  %v1438_v5 = vmov 839922192  }
  0x1a   : > { %v522_v0 = vld [vmem:[%s1828_s1] sm:$0xf]  ;;  %1370 = vset.pattern.permute.xlu0 %v1437_v1  ;;  %1372 = vset.pattern.permute.xlu1 %v1437_v1  ;;  %v965_v4 = vld [vmem:[%s1810_s14 + $0xc] sm:$0xf]  ;;  %v528_v6 = vunpack.c.l.s4 %v1438_v5  ;;  %v1310_v7 = vld [vmem:[%s1800_s4 + $0x38] sm:$0xff]  ;;  %vm558_vm0 = vcmask 1041408  }
  0x1b   : > { %525 = vperm.xlu0 %1370, %v522_v0   ;;  %1371 = vset.pattern.permute.xlu2 %v1437_v1  ;;  %v533_v2 = vld [vmem:[%s1829_s2] sm:$0xf]  ;;  %v1318_v8 = vld [vmem:[%s1800_s4 + $0x78] sm:$0xff]  ;;  %v1309_v9 = vld [vmem:[%s1800_s4 + $0x30] sm:$0xff]  ;;  %s1302_s2 = sshll.u32 %s516_s19, 3  ;;  %vm554_vm1 = vcmask 31744  }
  0x1c   : > { %741 = vmatpush.bf16.msra.mxu2 %v1310_v7  ;;  %754 = vmatpush.bf16.msra.mxu3 %v1318_v8  ;;  %v1317_v10 = vld [vmem:[%s1800_s4 + $0x70] sm:$0xff]  ;;  %v529_v12 = vunpack.c.0.s8 %v528_v6  ;;  %s519_s17 = scalar_lea.vmem %s1830_s23, %s1302_s2  ;;  %v1308_v13 = vld [vmem:[%s1800_s4 + $0x28] sm:$0xff]  ;;  %v1307_v17 = vld [vmem:[%s1800_s4 + $0x20] sm:$0xff]  ;;  %vm778_vm2 = vcmask 1043456   ;;  %vm922_vm3 = vcmask 1044480   ;;  %v1439_v43 = vmov 65535  }
  0x1d   : > { %v1316_v14 = vld [vmem:[%s1800_s4 + $0x68] sm:$0xff]  ;;  %v521_v16 = vld [vmem:[%s519_s17] sm:$0xff]  ;;  %v1306_v23 = vld [vmem:[%s1800_s4 + $0x18] sm:$0xff]  ;;  %v923_v44 = vsel %vm778_vm2, 4294967295, %v1439_v43  ;;  %vm774_vm4 = vcmask 64512   ;;  %vm826_vm5 = vcmask 293888  }
  0x1e   : > { %v1315_v18 = vld [vmem:[%s1800_s4 + $0x60] sm:$0xff]  ;;  %v1314_v24 = vld [vmem:[%s1800_s4 + $0x58] sm:$0xff]  ;;  %v1305_v26 = vld [vmem:[%s1800_s4 + $0x10] sm:$0xff]  ;;  %v1657_v45 = vsel %vm922_vm3, %v923_v44, 0  ;;  %vm918_vm6 = vcmask 72704   ;;  %vm1075_vm7 = vcmask 162816  }
  0x1f   : > { %v1313_v27 = vld [vmem:[%s1800_s4 + $0x50] sm:$0xff]  ;;  %v1304_v28 = vld [vmem:[%s1800_s4 + $0x8] sm:$0xff]  ;;  %v1006_v30 = vld [vmem:[%s1808_s12] sm:$0xf]  ;;  %s514_s19 = scalar_lea.vmem [#allocation3], %s1193_s28  ;;  %s1393_s28 = scalar_lea.hbm %s1812_s16, 32 }
  0x20   : > { %742 = vmatpush.bf16.msra.mxu2 %v1309_v9  ;;  %755 = vmatpush.bf16.msra.mxu3 %v1317_v10  ;;  %v1312_v29 = vld [vmem:[%s1800_s4 + $0x48] sm:$0xff]  ;;  %v1303_v35 = vld [vmem:[%s1800_s4] sm:$0xff]  ;;  %v1273_v5 = vld [vmem:[%s1804_s8 + $0x10] sm:$0xf]  ;;  %s1127_s30 = sshll.u32 %s514_s19, 4  ;;  %s1128_s30 = int_to_ptr.vmem [resolvable:$true] %s1127_s30 }
  0x21   : > { %v545_v38 = vld [vmem:[%s1799_s3] sm:$0xf]  ;;  %v1324_v40 = vld [vmem:[%s1806_s10 + $0x4] sm:$0x10]  ;;  %v1322_v6 = vld [vmem:[%s1804_s8 + $0x14] sm:$0xf0] }
  0x22   : > { %v1284_v39 = vld [vmem:[%s1806_s10] sm:$0xf] }
  0x23   : > { %536 = vperm.xlu0 %1370, %v533_v2   ;;  %v1311_v41 = vld [vmem:[%s1800_s4 + $0x40] sm:$0xff]  ;;  %v1285_v42 = vor.u32 %v1324_v40, %v1284_v39  ;;  %v870_v39 = vld [vmem:[%s1810_s14 + $0x8] sm:$0xf] }
  0x24   : > { %743 = vmatpush.bf16.msra.mxu2 %v1308_v13  ;;  %756 = vmatpush.bf16.msra.mxu3 %v1316_v14  ;;  %v767_v57 = vld [vmem:[%s1801_s5] sm:$0xff] }
  0x25   : > { %v926_v46 = vand.u32 %v1285_v42, %v1657_v45  ;;  %v769_v59 = vld [vmem:[%s1802_s6] sm:$0xff] }
  0x26   : > { %v800_v63 = vld [vmem:[%s1804_s8 + $0x20] sm:$0x33] }
  0x27   : > { %v814_v2 = vunpack.c.l.b16 %v800_v63  ;;  %v773_v9 = vld [vmem:[%s1803_s7] sm:$0x3] }
  0x28   : > { %744 = vmatpush.bf16.msra.mxu2 %v1307_v17  ;;  %757 = vmatpush.bf16.msra.mxu3 %v1315_v18  ;;  %v591_v13 = vld [vmem:[%s1809_s13] sm:$0xff]  ;;  %v1320_v17 = vld [vmem:[%s1804_s8 + $0x4] sm:$0xf0] }
  0x29   : > { %v599_v14 = vld [vmem:[%s1810_s14] sm:$0xff] }
  0x2b   : > { %960 = vperm.xlu0 %1370, %v957_v3  }
  0x2c   : > { %745 = vmatpush.bf16.msra.mxu2 %v1306_v23  ;;  %758 = vmatpush.bf16.msra.mxu3 %v1314_v24  ;;  %v1319_v24 = vld [vmem:[%s1804_s8 + $0x4] sm:$0xf] }
  0x30   : > { %746 = vmatpush.bf16.msra.mxu2 %v1305_v26  ;;  %759 = vmatpush.bf16.msra.mxu3 %v1313_v27  ;;  %v1044_v27 = vld [vmem:[%s1809_s13 + $0x10] sm:$0xf] }
  0x31   : > { %1047 = vperm.xlu2 %1371, %v1044_v27  }
  0x33   : > { %968 = vperm.xlu0 %1370, %v965_v4   ;;  %v820_v4 = vpack.c.b16 %v814_v2, %v814_v2 }
  0x34   : > { %747 = vmatpush.bf16.msra.mxu2 %v1304_v28  ;;  %760 = vmatpush.bf16.msra.mxu3 %v1312_v29 }
  0x35   : > { %v831_v10 = vsel %vm558_vm0, %v820_v4, 0 }
  0x38   : > { %748 = vmatpush.bf16.msra.mxu2 %v1303_v35  ;;  %761 = vmatpush.bf16.msra.mxu3 %v1311_v41 }
  0x3c   : > { %938 = vmatpush.bf16.msrb.mxu2 %v926_v46 }
  0x8d   : > { %v526_v11 = vpop.permute.xlu0 %525 }
  0x8e   : > { %v530_v15 = vperm.slane %v526_v11, %v529_v12 }
  0x90   : > { %v532_v20 = vmul.f32 %v530_v15, %v521_v16  ;;  %v815_v15 = vunpack.c.h.b16 %v800_v63  ;;  %v1265_v16 = vld [vmem:[%s1804_s8] sm:$0xf] }
  0x92   : > { %v821_v18 = vpack.c.b16 %v815_v15, %v815_v15 }
  0x95   : > { %v537_v19 = vpop.permute.xlu0 %536 }
  0x96   : > { %v541_v21 = vperm.slane %v537_v19, %v529_v12  ;;  %v1274_v12 = vor.u32 %v1322_v6, %v1273_v5  ;;  %v1266_v19 = vor.u32 %v1320_v17, %v1265_v16 }
  0x98   : > { %v543_v22 = vadd.f32 %v541_v21, %v532_v20  ;;  %v834_v20 = vsel %vm558_vm0, %v821_v18, 0  ;;  %v1321_v21 = vld [vmem:[%s1804_s8 + $0x14] sm:$0xf] }
  0x9a   : > { %v544_v25 = vmax.f32 %v543_v22, 0.0  ;;  %v1275_v22 = vld [vmem:[%s1804_s8 + $0x18] sm:$0xf0] }
  0x9b   : > { %v1278_v23 = vor.u32 %v1321_v21, %v1275_v22 }
  0x9c   : > { %547 = vst [vmem:[#allocation1] ss:$2 sm:$0xff] %v544_v25  ;;  %v1267_v25 = vld [vmem:[%s1804_s8 + $0x8] sm:$0xf0] }
  0x9d   : > { %v1270_v26 = vor.u32 %v1319_v24, %v1267_v25 }
  0xa3   : > { %v548_v31 = vld.sshfl [vmem:[#allocation1] sm:$0xff pattern:$0x75316420]  ;;  %v549_v32 = vld.sshfl [vmem:[#allocation1 + $0x8] sm:$0xff pattern:$0x75316420] }
  0xa4   : > { %v552_v33 = vpack.c.bf16 %v548_v31, %v548_v31  ;;  %v553_v34 = vpack.c.bf16 %v549_v32, %v549_v32  ;;  %1008 = vst [vmem:[#allocation1] ss:$4 sm:$0xff] %v1006_v30  ;;  %v1052_v30 = vld [vmem:[%s1810_s14 + $0x10] sm:$0xf] }
  0xa5   : > { %1055 = vperm.xlu2 %1371, %v1052_v30  }
  0xa6   : > { %v560_v36 = vsel %vm558_vm0, %v552_v33, 0  ;;  %v563_v37 = vsel %vm558_vm0, %v553_v34, 0  ;;  %v862_v33 = vld [vmem:[%s1809_s13 + $0x8] sm:$0xf] }
  0xa7   : > { %572 = vmatpush.bf16.msra.mxu0 %v560_v36  ;;  %585 = vmatpush.bf16.msra.mxu1 %v563_v37 }
  0xaa   : > { %1196 = vmatmul.msk.bf16.vlgmr.msra.gmra.mxu0 %vm554_vm1, %v545_v38  ;;  %1197 = vmatmul.msk.bf16.vlgmr.msra.gmra.mxu1 %vm554_vm1, %v545_v38 }
  0xab   : > { %v1010_v49 = vld.sshfl [vmem:[#allocation1 + $0x8] sm:$0xff pattern:$0x73625140]  ;;  %841 = vmatpush.bf16.msrb.mxu1 %v831_v10  ;;  %v1009_v35 = vld.sshfl [vmem:[#allocation1] sm:$0xff pattern:$0x73625140]  ;;  %v961_v10 = vpop.permute.xlu0 %960 }
  0xac   : > { %v1016_v52 = vsel %vm558_vm0, %v1010_v49, 0  ;;  %v1014_v37 = vsel %vm558_vm0, %v1009_v35, 0 }
  0xad   : > { %865 = vperm.xlu2 %1371, %v862_v33  }
  0xaf   : > { %842 = vmatpush.bf16.msrb.mxu1 %v1274_v12 }
  0xb3   : > { %843 = vmatpush.bf16.msrb.mxu1 %v1266_v19  ;;  %v969_v19 = vpop.permute.xlu0 %968 }
  0xb5   : > { %873 = vperm.xlu2 %1371, %v870_v39  }
 0x127   : > { %v1660_v47 = vpop.f32.mrf.mxu0  ;;  %v1662_v48 = vpop.f32.mrf.mxu1 }
 0x128   : > { %v611_v50 = vpack.c.bf16 %v1660_v47, %v1660_v47  ;;  %v612_v51 = vpack.c.bf16 %v1662_v48, %v1662_v48 }
 0x12a   : > { %749 = vmatmul.bf16.vlgmr.msra.gmra.mxu2 %v611_v50  ;;  %762 = vmatmul.bf16.vlgmr.msra.gmra.mxu3 %v612_v51  ;;  %v882_v51 = vld [vmem:[%s1805_s9] sm:$0x3] }
 0x12b   : > { %1038 = vmatpush.bf16.msra.mxu2 %v1016_v52  ;;  %v983_v52 = vld [vmem:[%s1807_s11] sm:$0x3] }
 0x12f   : > { %v576_v53 = vpop.f32.mrf.mxu0  ;;  %v589_v54 = vpop.f32.mrf.mxu1 }
 0x130   : > { %v1323_v53 = vld [vmem:[%s1806_s10 + $0x4] sm:$0xf]  ;;  %v1286_v54 = vld [vmem:[%s1806_s10 + $0x8] sm:$0x10] }
 0x1ad   : > { %v750_v55 = vpop.f32.mrf.mxu2  ;;  %v763_v56 = vpop.f32.mrf.mxu3 }
 0x1ae   : > { %v764_v58 = vadd.f32 %v763_v56, %v750_v55  ;;  %v1289_v55 = vor.u32 %v1323_v53, %v1286_v54 }
 0x1b0   : > { %v768_v60 = vmul.f32 %v767_v57, %v764_v58  ;;  %v929_v56 = vand.u32 %v1289_v55, %v1657_v45 }
 0x1b2   : > { %v770_v61 = vadd.f32 %v769_v59, %v768_v60  ;;  %951 = vmatpush.bf16.msrb.mxu3 %v929_v56 }
 0x1b4   : > { %v771_v62 = vmax.f32 %v770_v61, 0.0 }
 0x1b5   : > { %v752_v0 = vpop.f32.mrf.mxu2  ;;  %v765_v1 = vpop.f32.mrf.mxu3 }
 0x1b6   : > { %v772_v3 = vpack.c.bf16 %v771_v62, %v771_v62 }
 0x1b8   : > { %v780_v7 = vsel %vm778_vm2, %v772_v3, 0  ;;  %v884_v8 = vunpack.c.l.b16 %v772_v3 }
 0x1b9   : > { %789 = vmatpush.bf16.msrb.mxu0 %v780_v7 }
 0x1ba   : > { %v885_v11 = vpack.c.b16 %v884_v8, %v884_v8 }
 0x1bc   : > { %886 = vrot.lane.b32.xlu1 %v885_v11, %s1440_s29  ;;  %1262 = vmatmul.msk.bf16.vlgmr.msrb.gmra.mxu0 %vm774_vm4, %v773_v9  ;;  %s1325_s29 = sshll.u32 %s1548_s25, 4 }
 0x1bd   : > { %854 = vmatpush.bf16.msra.mxu0 %v834_v20  ;;  %s1125_s21 = scalar_lea.hbm %s1812_s16, %s1325_s29 }
 0x1be   : > { %s1129_s17 = sshll.u32 %s1125_s21, 4  ;;  %s1130_s17 = int_to_ptr.hbm [resolvable:$true] %s1129_s17 }
 0x1bf   : > { %s1387_s1 = sshra.s32 %s1130_s17, 4  ;;  %s1388_s1 = int_to_ptr.hbm [resolvable:$true] %s1387_s1 }
 0x1c0   : > { %s1389_s23 = scalar_lea.hbm %s1388_s1, 16  ;;  %p1394_p0 = scmp.lt.s32.totalorder %s1388_s1, %s1812_s16 }
 0x1c1   : > { %855 = vmatpush.bf16.msra.mxu0 %v1278_v23  ;;  %p1390_p11 = scmp.ne.s32.totalorder %s1388_s1, %s1389_s23  ;;  %p1395_p1 = scmp.lt.s32.totalorder %s1393_s28, %s1389_s23 }
 0x1c3   : > { %p1391_p12 = pnand %p1390_p11, %p1565_p5  ;;  %p1396_p2 = por %p1395_p1, %p1394_p0 }
 0x1c4   : > { %984 = vrot.lane.b32.xlu1 %v885_v11, %s1441_s27 }
 0x1c5   : > { %856 = vmatpush.bf16.msra.mxu0 %v1270_v26  ;;  %p1392_p13 = pneg %p1391_p12 }
 0x1c7   : > { %p1397_p3 = pnand %p1396_p2, %p1392_p13 }
 0x1cc   : > { %594 = vperm.xlu1 %1372, %v591_v13  }
 0x1d4   : > { %602 = vperm.xlu1 %1372, %v599_v14  }
 0x22e   : > { %v887_v28 = vpop.permute.xlu1 %886 }
 0x22f   : > { %v892_v29 = vsel %vm778_vm2, %v887_v28, 0 }
 0x230   : > { %901 = vmatpush.bf16.msra.mxu1 %v892_v29 }
 0x236   : > { %v985_v31 = vpop.permute.xlu1 %984 }
 0x237   : > { %v990_v32 = vsel %vm778_vm2, %v985_v31, 0 }
 0x238   : > { %999 = vmatpush.bf16.msrb.mxu0 %v990_v32 }
 0x239   : > { %v791_v34 = vpop.f32.mrf.mxu0 }
 0x23a   : > { %v795_v36 = vpack.c.bf16 %v791_v34, %v791_v34 }
 0x23c   : > { %1279 = vmatmul.msk.bf16.vlgmr.msrb.gmra.mxu1 %vm826_vm5, %v795_v36  ;;  %1280 = vmatmul.msk.bf16.vlgmr.msra.gmra.mxu0 %vm826_vm5, %v795_v36 }
 0x23d   : > { %1025 = vmatpush.bf16.msrb.mxu1 %v1014_v37  ;;  %v1064_v37 = vld [vmem:[%s1811_s15] sm:$0xf] }
 0x23e   : > { %v595_v38 = vpop.permute.xlu1 %594 }
 0x23f   : > { %v597_v41 = vmul.f32 %v595_v38, %v1660_v47  ;;  %v598_v42 = vmul.f32 %v595_v38, %v1662_v48  ;;  %v1048_v47 = vpop.permute.xlu2 %1047 }
 0x241   : > { %v793_v40 = vpop.f32.mrf.mxu0 }
 0x246   : > { %v603_v43 = vpop.permute.xlu1 %602 }
 0x247   : > { %v1732_v44 = vadd.f32 %v603_v43, %v597_v41  ;;  %v1734_v46 = vadd.f32 %v603_v43, %v598_v42  ;;  %v1056_v48 = vpop.permute.xlu2 %1055 }
 0x249   : > { %v607_v49 = vmax.f32 %v1732_v44, 0.0  ;;  %v608_v50 = vmax.f32 %v1734_v46, 0.0 }
 0x24c   : > { %1281 = vmatmul.msk.bf16.vlgmr.msra.gmra.mxu1 %vm774_vm4, %v882_v51  ;;  %1292 = vmatmul.msk.bf16.vlgmr.msrb.gmra.mxu0 %vm774_vm4, %v983_v52 }
 0x24f   : > { %v866_v57 = vpop.permute.xlu2 %865 }
 0x257   : > { %v874_v58 = vpop.permute.xlu2 %873 }
 0x2b9   : > { %v845_v59 = vpop.f32.mrf.mxu1  ;;  %v858_v60 = vpop.f32.mrf.mxu0 }
 0x2ba   : > { %v868_v61 = vmul.f32 %v866_v57, %v845_v59  ;;  %v869_v62 = vmul.f32 %v866_v57, %v858_v60 }
 0x2bc   : > { %v876_v63 = vadd.f32 %v874_v58, %v868_v61  ;;  %v877_v0 = vadd.f32 %v874_v58, %v869_v62 }
 0x2be   : > { %v878_v1 = vmax.f32 %v876_v63, 0.0  ;;  %v879_v2 = vmax.f32 %v877_v0, 0.0 }
 0x2c0   : > { %880 = vst [vmem:[#allocation2 + $0x8] sm:$0xf] %v878_v1 }
 0x2c1   : > { %881 = vst [vmem:[#allocation2] sm:$0xf] %v879_v2  ;;  %v847_v3 = vpop.f32.mrf.mxu1  ;;  %v860_v4 = vpop.f32.mrf.mxu0 }
 0x2c9   : > { %v903_v5 = vpop.f32.mrf.mxu1  ;;  %v1001_v6 = vpop.f32.mrf.mxu0 }
 0x2ca   : > { %v907_v7 = vpack.c.bf16 %v903_v5, %v903_v5  ;;  %v1005_v45 = vpack.c.bf16 %v1001_v6, %v1001_v6 }
 0x2cc   : > { %1290 = vmatmul.msk.bf16.vlgmr.msrb.gmra.mxu2 %vm918_vm6, %v907_v7  ;;  %1291 = vmatmul.msk.bf16.vlgmr.msrb.gmra.mxu3 %vm918_vm6, %v907_v7 }
 0x2cd   : > { %1293 = vmatmul.msk.bf16.vlgmr.msrb.gmra.mxu1 %vm554_vm1, %v1005_v45 }
 0x2d1   : > { %v905_v8 = vpop.f32.mrf.mxu1  ;;  %v1003_v9 = vpop.f32.mrf.mxu0 }
 0x2dc   : > { %1294 = vmatmul.msk.bf16.vlgmr.msra.gmra.mxu2 %vm554_vm1, %v1005_v45 }
 0x34a   : > { %v1027_v11 = vpop.f32.mrf.mxu1 }
 0x34b   : > { %v1050_v12 = vmul.f32 %v1048_v47, %v1027_v11 }
 0x34d   : > { %v1058_v13 = vadd.f32 %v1056_v48, %v1050_v12 }
 0x34f   : > { %v1060_v14 = vmax.f32 %v1058_v13, 0.0  ;;  %v940_v15 = vpop.f32.mrf.mxu2  ;;  %v953_v16 = vpop.f32.mrf.mxu3 }
 0x350   : > { %v963_v17 = vmul.f32 %v961_v10, %v940_v15  ;;  %v964_v18 = vmul.f32 %v961_v10, %v953_v16 }
 0x351   : > { %1062 = vst [vmem:[#allocation2 + $0x18] sm:$0xf] %v1060_v14 }
 0x352   : > { %v971_v20 = vadd.f32 %v969_v19, %v963_v17  ;;  %v972_v21 = vadd.f32 %v969_v19, %v964_v18  ;;  %v1029_v22 = vpop.f32.mrf.mxu1 }
 0x354   : > { %v973_v23 = vmax.f32 %v971_v20, 0.0  ;;  %v974_v24 = vmax.f32 %v972_v21, 0.0 }
 0x356   : > { %v977_v25 = vrot.slane %v973_v23, 4  ;;  %v978_v26 = vrot.slane %v974_v24, 4 }
 0x357   : > { %v942_v27 = vpop.f32.mrf.mxu2  ;;  %v955_v28 = vpop.f32.mrf.mxu3 }
 0x358   : > { %981 = vst [vmem:[#allocation2 + $0x8] sm:$0xf0] %v977_v25  ;;  %v1069_v29 = vld [vmem:[#allocation2 + $0x18] sm:$0xf] }
 0x359   : > { %982 = vst [vmem:[#allocation2] sm:$0xf0] %v978_v26  ;;  %v1073_v30 = vpack.c.bf16 %v1069_v29, %v1069_v29 }
 0x35b   : > { %v1080_v31 = vsel %vm558_vm0, %v1073_v30, 0 }
 0x35c   : > { %1091 = vmatpush.bf16.msra.mxu3 %v1080_v31 }
 0x35f   : > { %v1040_v32 = vpop.f32.mrf.mxu2  ;;  %v1067_v33 = vld [vmem:[#allocation2 + $0x8] sm:$0xff] }
 0x360   : > { %v1051_v34 = vmul.f32 %v1048_v47, %v1040_v32  ;;  %v1071_v35 = vpack.c.bf16 %v1067_v33, %v607_v49  ;;  %v1068_v43 = vld [vmem:[#allocation2] sm:$0xff] }
 0x361   : > { %v1072_v44 = vpack.c.bf16 %v1068_v43, %v608_v50 }
 0x362   : > { %v1059_v36 = vadd.f32 %v1056_v48, %v1051_v34  ;;  %1092 = vmatpush.bf16.msra.mxu3 %v1071_v35 }
 0x364   : > { %v1061_v38 = vmax.f32 %v1059_v36, 0.0 }
 0x365   : > { %1295 = vmatmul.msk.bf16.vlgmr.msra.gmra.mxu3 %vm1075_vm7, %v1064_v37 }
 0x366   : > { %1063 = vst [vmem:[#allocation2 + $0x20] sm:$0xf] %v1061_v38 }
 0x367   : > { %v1042_v39 = vpop.f32.mrf.mxu2 }
 0x36d   : > { %v1070_v40 = vld [vmem:[#allocation2 + $0x20] sm:$0xf] }
 0x36e   : > { %v1074_v41 = vpack.c.bf16 %v1070_v40, %v1070_v40 }
 0x370   : > { %v1083_v42 = vsel %vm558_vm0, %v1074_v41, 0 }
 0x371   : > { %1104 = vmatpush.bf16.msra.mxu0 %v1083_v42 }
 0x375   : > { %1105 = vmatpush.bf16.msra.mxu0 %v1072_v44 }
 0x378   : > { %1296 = vmatmul.msk.bf16.vlgmr.msra.gmra.mxu0 %vm1075_vm7, %v1064_v37 }
 0x3e8   : > { %v1094_v49 = vpop.f32.mrf.mxu3 }
 0x3e9   : > { %1111 = vst [vmem:[%s514_s19] sm:$0xff] %v1094_v49 }
 0x3f0   : > { %v1096_v51 = vpop.f32.mrf.mxu3 }
 0x3f5   : > { %v1107_v46 = vpop.f32.mrf.mxu0 }
 0x3f6   : > { %1112 = vst [vmem:[%s514_s19 + $0x8] sm:$0xff] %v1107_v46 }
 0x3f7   : > { %1400 = shalt.err (!%p1397_p3)
}
 0x3f8   : > { %1326 = dma.vmem_to_hbm [thread:$0]  (%p1565_p5), %s1128_s30, 256, %s1130_s17, %s1114_s18  }
 0x3fd   : > { %v1109_v50 = vpop.f32.mrf.mxu0 }
 0x3fe PF: > { %s1831_s26 = sld [smem:[#allocation6_spill]]  ;;  %p1332_p4 = scmp.ge.s32.totalorder %s1435_s24, 2 }
 0x400   : > { %p1329_p7 = pnand %p1332_p4, %p1569_p6 }
 0x402   : > { %p1330_p8 = pneg %p1329_p7 }
 0x404   : > { %s1141_s2 = sand.u32 1, %s1831_s26  }
 0x405   : > { %s1142_s21 = scalar_lea.sflag [#allocation4], %s1141_s2 }
 0x406   : > { %1418 = dma.done.wait (%p1330_p8), %s1142_s21, 256  }
 0x407   : > { %1420 = vsyncadd (%p1330_p8), %s1142_s21, 4294967040  ;;  %s1833_s24 = sld [smem:[#allocation8_spill]]  ;;  %s1836_s21 = smov %s1427_s22 }
 0x408   : > { %s1834_s1 = sld [smem:[#allocation7_spill]] }
 0x409   : > { %s1835_s23 = sld [smem:[#allocation9_spill]] }
 0x40d   : > { %p26_p9 = scmp.ge.s32.totalorder %s1833_s24, 4  }
 0x40e   : > { %s1837_s22 = smov %s1834_s1 }
 0x40f   :  { %28 = sbr.rel (!%p26_p9) target bundleno = 7 (0x7), region = 119 }
 0x414   :  { %1148 = vsyncpa [#allocation4], 1 }
 0x415   :  { %1150 = vsyncpa [#allocation4 + $0x1], 1 }

</bundles_post_ra>
